<compile_context>
chip_gen: v6e
topology: v6e:2x2x1
jax: 0.10.0
libtpu: 0.0.40
codegen_flags: <defaults>
</compile_context>

<pallas_src>
import math
from functools import partial

import jax
import jax.numpy as jnp
from jax import lax
from jax.experimental import pallas as pl
from jax.experimental.pallas import tpu as pltpu


def _round_up(x, m):
    return ((x + m - 1) // m) * m


def _gelu_exact(x):
    # PyTorch nn.GELU() default = exact erf formulation.
    # (tanh-approx would move the work VPU->EUP, biggest win on v5e, but it
    #  slightly changes numerics vs. the PyTorch reference, so keep erf.)
    return 0.5 * x * (1.0 + lax.erf(x * (1.0 / math.sqrt(2.0))))


def _layernorm_masked(h, gamma, beta, real_n, eps=1e-5):
    """LayerNorm over the last axis with statistics restricted to the first
    `real_n` lanes (the remaining lanes are zero padding)."""
    hp = h.shape[-1]
    if real_n == hp:
        mean = jnp.mean(h, axis=-1, keepdims=True)
        cent = h - mean
        var = jnp.mean(cent * cent, axis=-1, keepdims=True)
    else:
        lane = lax.broadcasted_iota(jnp.int32, h.shape, h.ndim - 1)
        mask = lane < real_n
        inv_n = 1.0 / float(real_n)
        mean = jnp.sum(jnp.where(mask, h, 0.0), axis=-1, keepdims=True) * inv_n
        cent = jnp.where(mask, h - mean, 0.0)
        var = jnp.sum(cent * cent, axis=-1, keepdims=True) * inv_n
    # gamma/beta are zero in the padded lanes, so padded outputs stay 0.
    return (h - mean) * lax.rsqrt(var + eps) * gamma + beta


def ffnn_kernel(hidden_real, tok_ref, emb_ref, *refs):
    """Fused forward.
    refs = (w_0, ..., w_{n_hidden-1}, w_out, vec_pack, out).
    vec_pack rows: [b_0, gamma_0, beta_0, b_1, ..., beta_{n-1}, b_out]."""
    n_hidden = len(hidden_real)
    o_ref = refs[-1]
    vec_ref = refs[-2]
    wout_ref = refs[-3]
    w_refs = refs[:n_hidden]

    TB = o_ref.shape[0]
    V_emb, D = emb_ref.shape
    C = tok_ref.shape[0]

    # ---- fused embedding gather + first Linear (all on the MXU) ----------
    iota_v = lax.broadcasted_iota(jnp.int32, (TB, V_emb), 1)
    w0_ref = w_refs[0]
    h = jnp.zeros((TB, w0_ref.shape[1]), jnp.float32)
    for c in range(C):                                   # C is small & static
        tok_c = tok_ref[c]                               # (TB, 1) int32
        oh = (iota_v == tok_c).astype(jnp.float32)       # (TB, V) one-hot
        e_c = jnp.dot(oh, emb_ref[...],
                      preferred_element_type=jnp.float32)        # (TB, D)
        h = h + jnp.dot(e_c, w0_ref[c * D:(c + 1) * D, :],
                        preferred_element_type=jnp.float32)      # (TB, H0p)

    # ---- hidden stack: (+bias) -> GELU -> (dropout=identity) -> LayerNorm --
    for l in range(n_hidden):
        hp = w_refs[l].shape[1]
        if l > 0:
            h = jnp.dot(h, w_refs[l][...], preferred_element_type=jnp.float32)
        b_l = vec_ref[3 * l + 0:3 * l + 1, 0:hp]
        g_l = vec_ref[3 * l + 1:3 * l + 2, 0:hp]
        be_l = vec_ref[3 * l + 2:3 * l + 3, 0:hp]
        h = _gelu_exact(h + b_l)
        h = _layernorm_masked(h, g_l, be_l, hidden_real[l])

    # ---- vocab projection --------------------------------------------------
    vocab = wout_ref.shape[1]
    b_out = vec_ref[3 * n_hidden:3 * n_hidden + 1, 0:vocab]
    o_ref[...] = jnp.dot(h, wout_ref[...],
                         preferred_element_type=jnp.float32) + b_out


def pack_ffnn_params(context_size, embedding_dim, layer_params, out_w, out_b):
    """One-time weight preparation: zero-pad hidden dims up to multiples of
    128 (lane-dense) and pack every small (1, h) vector into a single array."""
    n_hidden = len(layer_params)
    assert n_hidden >= 1  # TODO(synk): support hidden_sizes=[] (single Linear).
    vocab = out_w.shape[1]
    hidden_real = tuple(int(w.shape[1]) for (w, _, _, _) in layer_params)
    hidden_pad = tuple(_round_up(h, 128) for h in hidden_real)
    P = _round_up(max(max(hidden_pad), vocab), 128)

    padded_w, rows = [], []
    prev_real = context_size * embedding_dim
    prev_pad = prev_real
    for l, (w, b, g, be) in enumerate(layer_params):
        hr, hp = hidden_real[l], hidden_pad[l]
        wp = jnp.zeros((prev_pad, hp), jnp.float32).at[:prev_real, :hr].set(w)
        padded_w.append(wp)
        for v in (b, g, be):
            rows.append(jnp.zeros((P,), jnp.float32).at[:hr].set(v.reshape(-1)))
        prev_real, prev_pad = hr, hp
    wout_p = jnp.zeros((prev_pad, vocab), jnp.float32).at[:prev_real, :].set(out_w)
    rows.append(jnp.zeros((P,), jnp.float32).at[:vocab].set(out_b.reshape(-1)))
    vec_pack = jnp.stack(rows, axis=0)
    return padded_w, wout_p, vec_pack, hidden_real


def ffnn_forward(x_tokens, embed_table, padded_w, wout_p, vec_pack, hidden_real):
    """x_tokens: (B, context_size) int32 token ids -> logits (B, vocab) f32."""
    B, C = x_tokens.shape
    vocab = wout_p.shape[1]

    # Batch tiling: one block for small B; tile (and let "parallel" shard
    # across v7x's two TensorCores) once the batch grows.
    TB = B if B <= 256 else 256
    grid = (pl.cdiv(B, TB),)

    # Token ids as (C, B, 1) so the kernel indexes context positions on the
    # leading axis (tiny int32 transpose = glue).
    tok3 = x_tokens.astype(jnp.int32).T[:, :, None]

    vmem_full = pl.BlockSpec(memory_space=pltpu.MemorySpace.VMEM)
    in_specs = [pl.BlockSpec((C, TB, 1), lambda i: (0, i, 0)),  # tokens (blocked)
                vmem_full]                                      # embedding table
    in_specs += [vmem_full] * (len(padded_w) + 2)               # weights + wout + vec

    return pl.pallas_call(
        partial(ffnn_kernel, hidden_real),
        out_shape=jax.ShapeDtypeStruct((B, vocab), jnp.float32),
        grid=grid,
        in_specs=in_specs,
        out_specs=pl.BlockSpec((TB, vocab), lambda i: (i, 0)),
        compiler_params=pltpu.CompilerParams(
            dimension_semantics=("parallel",)),
    )(tok3, embed_table.astype(jnp.float32), *padded_w, wout_p, vec_pack)


def xavier_uniform(key, fan_in, fan_out):
    limit = math.sqrt(6.0 / (fan_in + fan_out))
    return jax.random.uniform(
        key, (fan_in, fan_out), minval=-limit, maxval=limit, dtype=jnp.float32
    )


if __name__ == "__main__":
    # Small, module-consistent shapes.
    vocab_size = 256
    embedding_dim = 32
    context_size = 4
    hidden_sizes = [64, 32]
    batch = 8

    key = jax.random.PRNGKey(0)
    k_emb, k_x, *k_layers = jax.random.split(key, 2 + len(hidden_sizes) + 1)

    # Deterministic "pretrained" embedding table.
    embed_table = jax.random.normal(
        k_emb, (vocab_size, embedding_dim), dtype=jnp.float32
    )

    # Linear / LayerNorm params (xavier-uniform weights, zero biases,
    # gamma=1, beta=0 — matching the PyTorch __init__).
    layer_params = []
    prev = context_size * embedding_dim
    for i, h in enumerate(hidden_sizes):
        w = xavier_uniform(k_layers[i], prev, h)            # used as x @ w
        b = jnp.zeros((1, h), dtype=jnp.float32)
        gamma = jnp.ones((1, h), dtype=jnp.float32)
        beta = jnp.zeros((1, h), dtype=jnp.float32)
        layer_params.append((w, b, gamma, beta))
        prev = h
    out_w = xavier_uniform(k_layers[len(hidden_sizes)], prev, vocab_size)
    out_b = jnp.zeros((1, vocab_size), dtype=jnp.float32)

    x_tokens = jax.random.randint(
        k_x, (batch, context_size), 0, vocab_size, dtype=jnp.int32
    )

    # One-time weight preparation (pad + pack).
    padded_w, wout_p, vec_pack, hidden_real = pack_ffnn_params(
        context_size, embedding_dim, layer_params, out_w, out_b
    )

    logits = ffnn_forward(
        x_tokens, embed_table, padded_w, wout_p, vec_pack, hidden_real
    )
    logits = jax.block_until_ready(logits)

    # Pure-JAX reference (same math as the PyTorch forward in eval mode).
    def reference(tok):
        flat = jnp.take(embed_table, tok, axis=0).reshape(tok.shape[0], -1)
        h = flat
        for (w, b, g, be) in layer_params:
            h = h @ w + b
            h = 0.5 * h * (1.0 + lax.erf(h / jnp.sqrt(2.0)))
            mean = jnp.mean(h, axis=-1, keepdims=True)
            var = jnp.mean((h - mean) ** 2, axis=-1, keepdims=True)
            h = (h - mean) * lax.rsqrt(var + 1e-5) * g + be
        return h @ out_w + out_b

    ref = reference(x_tokens)
    assert logits.shape == (batch, vocab_size)
    assert bool(jnp.all(jnp.isfinite(logits)))
    assert bool(jnp.allclose(logits, ref, atol=5e-2, rtol=5e-2)), float(
        jnp.max(jnp.abs(logits - ref))
    )
    print("KERNEL_OK")
</pallas_src>

<mosaic_0001>
module attributes {stable_mosaic.version = 11 : i64} {
  func.func @ffnn_kernel(%arg0: i32, %arg1: memref<4x8x1xi32, #tpu.memory_space<vmem>>, %arg2: memref<256x32xf32, #tpu.memory_space<vmem>>, %arg3: memref<128x128xf32, #tpu.memory_space<vmem>>, %arg4: memref<128x128xf32, #tpu.memory_space<vmem>>, %arg5: memref<128x256xf32, #tpu.memory_space<vmem>>, %arg6: memref<7x256xf32, #tpu.memory_space<vmem>>, %arg7: memref<8x256xf32, #tpu.memory_space<vmem>>) attributes {dimension_semantics = [#tpu.dimension_semantics<parallel>], iteration_bounds = array<i64: 1>, scalar_prefetch = 0 : i64, scratch_operands = 0 : i64, tpu.core_type = #tpu.core_type<tc>, window_params = [{transform_indices = @transform_0, window_bounds = array<i64: 4, 8, 1>}, {pipeline_mode = #tpu.pipeline_mode<synchronous>, transform_indices = @transform_1, window_bounds = array<i64: 256, 32>}, {pipeline_mode = #tpu.pipeline_mode<synchronous>, transform_indices = @transform_2, window_bounds = array<i64: 128, 128>}, {pipeline_mode = #tpu.pipeline_mode<synchronous>, transform_indices = @transform_3, window_bounds = array<i64: 128, 128>}, {pipeline_mode = #tpu.pipeline_mode<synchronous>, transform_indices = @transform_4, window_bounds = array<i64: 128, 256>}, {pipeline_mode = #tpu.pipeline_mode<synchronous>, transform_indices = @transform_5, window_bounds = array<i64: 7, 256>}, {transform_indices = @transform_6, window_bounds = array<i64: 8, 256>}]} {
    %0 = tpu.iota {dimensions = array<i32: 1>} : vector<8x256xi32>
    %cst = arith.constant 0.000000e+00 : f32
    %1 = vector.broadcast %cst : f32 to vector<8x128xf32>
    %c0 = arith.constant 0 : index
    %c0_0 = arith.constant 0 : index
    %c0_1 = arith.constant 0 : index
    %2 = vector.load %arg1[%c0, %c0_0, %c0_1] : memref<4x8x1xi32, #tpu.memory_space<vmem>>, vector<1x8x1xi32>
    %3 = vector.shape_cast %2 : vector<1x8x1xi32> to vector<8x1xi32>
    %4 = vector.broadcast %3 : vector<8x1xi32> to vector<8x256xi32>
    %5 = arith.cmpi eq, %0, %4 : vector<8x256xi32>
    %6 = arith.extui %5 : vector<8x256xi1> to vector<8x256xi32>
    %7 = arith.sitofp %6 : vector<8x256xi32> to vector<8x256xf32>
    %c0_2 = arith.constant 0 : index
    %c0_3 = arith.constant 0 : index
    %8 = vector.load %arg2[%c0_2, %c0_3] : memref<256x32xf32, #tpu.memory_space<vmem>>, vector<256x32xf32>
    %cst_4 = arith.constant dense<0.000000e+00> : vector<8x32xf32>
    %9 = tpu.matmul %7, %8, %cst_4 {dimension_numbers = #tpu.dot_dimension_numbers<[1], [0], [0], [1], [0, 0, 1, 1], [], []>} : vector<8x256xf32>, vector<256x32xf32>, vector<8x32xf32> -> vector<8x32xf32>
    %c0_5 = arith.constant 0 : index
    %c0_6 = arith.constant 0 : index
    %10 = vector.load %arg3[%c0_5, %c0_6] : memref<128x128xf32, #tpu.memory_space<vmem>>, vector<32x128xf32>
    %cst_7 = arith.constant dense<0.000000e+00> : vector<8x128xf32>
    %11 = tpu.matmul %9, %10, %cst_7 {dimension_numbers = #tpu.dot_dimension_numbers<[1], [0], [0], [1], [0, 0, 1, 1], [], []>} : vector<8x32xf32>, vector<32x128xf32>, vector<8x128xf32> -> vector<8x128xf32>
    %12 = arith.addf %1, %11 : vector<8x128xf32>
    %c1 = arith.constant 1 : index
    %c0_8 = arith.constant 0 : index
    %c0_9 = arith.constant 0 : index
    %13 = vector.load %arg1[%c1, %c0_8, %c0_9] : memref<4x8x1xi32, #tpu.memory_space<vmem>>, vector<1x8x1xi32>
    %14 = vector.shape_cast %13 : vector<1x8x1xi32> to vector<8x1xi32>
    %15 = vector.broadcast %14 : vector<8x1xi32> to vector<8x256xi32>
    %16 = arith.cmpi eq, %0, %15 : vector<8x256xi32>
    %17 = arith.extui %16 : vector<8x256xi1> to vector<8x256xi32>
    %18 = arith.sitofp %17 : vector<8x256xi32> to vector<8x256xf32>
    %c0_10 = arith.constant 0 : index
    %c0_11 = arith.constant 0 : index
    %19 = vector.load %arg2[%c0_10, %c0_11] : memref<256x32xf32, #tpu.memory_space<vmem>>, vector<256x32xf32>
    %cst_12 = arith.constant dense<0.000000e+00> : vector<8x32xf32>
    %20 = tpu.matmul %18, %19, %cst_12 {dimension_numbers = #tpu.dot_dimension_numbers<[1], [0], [0], [1], [0, 0, 1, 1], [], []>} : vector<8x256xf32>, vector<256x32xf32>, vector<8x32xf32> -> vector<8x32xf32>
    %c32 = arith.constant 32 : index
    %c0_13 = arith.constant 0 : index
    %21 = vector.load %arg3[%c32, %c0_13] : memref<128x128xf32, #tpu.memory_space<vmem>>, vector<32x128xf32>
    %cst_14 = arith.constant dense<0.000000e+00> : vector<8x128xf32>
    %22 = tpu.matmul %20, %21, %cst_14 {dimension_numbers = #tpu.dot_dimension_numbers<[1], [0], [0], [1], [0, 0, 1, 1], [], []>} : vector<8x32xf32>, vector<32x128xf32>, vector<8x128xf32> -> vector<8x128xf32>
    %23 = arith.addf %12, %22 : vector<8x128xf32>
    %c2 = arith.constant 2 : index
    %c0_15 = arith.constant 0 : index
    %c0_16 = arith.constant 0 : index
    %24 = vector.load %arg1[%c2, %c0_15, %c0_16] : memref<4x8x1xi32, #tpu.memory_space<vmem>>, vector<1x8x1xi32>
    %25 = vector.shape_cast %24 : vector<1x8x1xi32> to vector<8x1xi32>
    %26 = vector.broadcast %25 : vector<8x1xi32> to vector<8x256xi32>
    %27 = arith.cmpi eq, %0, %26 : vector<8x256xi32>
    %28 = arith.extui %27 : vector<8x256xi1> to vector<8x256xi32>
    %29 = arith.sitofp %28 : vector<8x256xi32> to vector<8x256xf32>
    %c0_17 = arith.constant 0 : index
    %c0_18 = arith.constant 0 : index
    %30 = vector.load %arg2[%c0_17, %c0_18] : memref<256x32xf32, #tpu.memory_space<vmem>>, vector<256x32xf32>
    %cst_19 = arith.constant dense<0.000000e+00> : vector<8x32xf32>
    %31 = tpu.matmul %29, %30, %cst_19 {dimension_numbers = #tpu.dot_dimension_numbers<[1], [0], [0], [1], [0, 0, 1, 1], [], []>} : vector<8x256xf32>, vector<256x32xf32>, vector<8x32xf32> -> vector<8x32xf32>
    %c64 = arith.constant 64 : index
    %c0_20 = arith.constant 0 : index
    %32 = vector.load %arg3[%c64, %c0_20] : memref<128x128xf32, #tpu.memory_space<vmem>>, vector<32x128xf32>
    %cst_21 = arith.constant dense<0.000000e+00> : vector<8x128xf32>
    %33 = tpu.matmul %31, %32, %cst_21 {dimension_numbers = #tpu.dot_dimension_numbers<[1], [0], [0], [1], [0, 0, 1, 1], [], []>} : vector<8x32xf32>, vector<32x128xf32>, vector<8x128xf32> -> vector<8x128xf32>
    %34 = arith.addf %23, %33 : vector<8x128xf32>
    %c3 = arith.constant 3 : index
    %c0_22 = arith.constant 0 : index
    %c0_23 = arith.constant 0 : index
    %35 = vector.load %arg1[%c3, %c0_22, %c0_23] : memref<4x8x1xi32, #tpu.memory_space<vmem>>, vector<1x8x1xi32>
    %36 = vector.shape_cast %35 : vector<1x8x1xi32> to vector<8x1xi32>
    %37 = vector.broadcast %36 : vector<8x1xi32> to vector<8x256xi32>
    %38 = arith.cmpi eq, %0, %37 : vector<8x256xi32>
    %39 = arith.extui %38 : vector<8x256xi1> to vector<8x256xi32>
    %40 = arith.sitofp %39 : vector<8x256xi32> to vector<8x256xf32>
    %c0_24 = arith.constant 0 : index
    %c0_25 = arith.constant 0 : index
    %41 = vector.load %arg2[%c0_24, %c0_25] : memref<256x32xf32, #tpu.memory_space<vmem>>, vector<256x32xf32>
    %cst_26 = arith.constant dense<0.000000e+00> : vector<8x32xf32>
    %42 = tpu.matmul %40, %41, %cst_26 {dimension_numbers = #tpu.dot_dimension_numbers<[1], [0], [0], [1], [0, 0, 1, 1], [], []>} : vector<8x256xf32>, vector<256x32xf32>, vector<8x32xf32> -> vector<8x32xf32>
    %c96 = arith.constant 96 : index
    %c0_27 = arith.constant 0 : index
    %43 = vector.load %arg3[%c96, %c0_27] : memref<128x128xf32, #tpu.memory_space<vmem>>, vector<32x128xf32>
    %cst_28 = arith.constant dense<0.000000e+00> : vector<8x128xf32>
    %44 = tpu.matmul %42, %43, %cst_28 {dimension_numbers = #tpu.dot_dimension_numbers<[1], [0], [0], [1], [0, 0, 1, 1], [], []>} : vector<8x32xf32>, vector<32x128xf32>, vector<8x128xf32> -> vector<8x128xf32>
    %45 = arith.addf %34, %44 : vector<8x128xf32>
    %c0_29 = arith.constant 0 : index
    %c0_30 = arith.constant 0 : index
    %46 = vector.load %arg6[%c0_29, %c0_30] : memref<7x256xf32, #tpu.memory_space<vmem>>, vector<1x128xf32>
    %c1_31 = arith.constant 1 : index
    %c0_32 = arith.constant 0 : index
    %47 = vector.load %arg6[%c1_31, %c0_32] : memref<7x256xf32, #tpu.memory_space<vmem>>, vector<1x128xf32>
    %c2_33 = arith.constant 2 : index
    %c0_34 = arith.constant 0 : index
    %48 = vector.load %arg6[%c2_33, %c0_34] : memref<7x256xf32, #tpu.memory_space<vmem>>, vector<1x128xf32>
    %49 = vector.broadcast %46 : vector<1x128xf32> to vector<8x128xf32>
    %50 = arith.addf %45, %49 : vector<8x128xf32>
    %cst_35 = arith.constant 5.000000e-01 : f32
    %51 = vector.broadcast %cst_35 : f32 to vector<8x128xf32>
    %52 = arith.mulf %51, %50 : vector<8x128xf32>
    %cst_36 = arith.constant 0.707106769 : f32
    %53 = vector.broadcast %cst_36 : f32 to vector<8x128xf32>
    %54 = arith.mulf %50, %53 : vector<8x128xf32>
    %55 = math.erf %54 : vector<8x128xf32>
    %cst_37 = arith.constant 1.000000e+00 : f32
    %56 = vector.broadcast %cst_37 : f32 to vector<8x128xf32>
    %57 = arith.addf %56, %55 : vector<8x128xf32>
    %58 = arith.mulf %52, %57 : vector<8x128xf32>
    %59 = tpu.iota {dimensions = array<i32: 1>} : vector<8x128xi32>
    %c64_i32 = arith.constant 64 : i32
    %60 = vector.broadcast %c64_i32 : i32 to vector<8x128xi32>
    %61 = arith.cmpi slt, %59, %60 : vector<8x128xi32>
    %cst_38 = arith.constant 0.000000e+00 : f32
    %62 = vector.broadcast %cst_38 : f32 to vector<8x128xf32>
    %63 = arith.select %61, %58, %62 : vector<8x128xi1>, vector<8x128xf32>
    %cst_39 = arith.constant dense<0.000000e+00> : vector<8xf32>
    %64 = vector.multi_reduction <add>, %63, %cst_39 [1] : vector<8x128xf32> to vector<8xf32>
    %65 = vector.shape_cast %64 : vector<8xf32> to vector<8x1xf32>
    %cst_40 = arith.constant 1.562500e-02 : f32
    %66 = vector.broadcast %cst_40 : f32 to vector<8x1xf32>
    %67 = arith.mulf %65, %66 : vector<8x1xf32>
    %68 = vector.broadcast %67 : vector<8x1xf32> to vector<8x128xf32>
    %69 = arith.subf %58, %68 : vector<8x128xf32>
    %cst_41 = arith.constant 0.000000e+00 : f32
    %70 = vector.broadcast %cst_41 : f32 to vector<8x128xf32>
    %71 = arith.select %61, %69, %70 : vector<8x128xi1>, vector<8x128xf32>
    %72 = arith.mulf %71, %71 : vector<8x128xf32>
    %cst_42 = arith.constant dense<0.000000e+00> : vector<8xf32>
    %73 = vector.multi_reduction <add>, %72, %cst_42 [1] : vector<8x128xf32> to vector<8xf32>
    %74 = vector.shape_cast %73 : vector<8xf32> to vector<8x1xf32>
    %cst_43 = arith.constant 1.562500e-02 : f32
    %75 = vector.broadcast %cst_43 : f32 to vector<8x1xf32>
    %76 = arith.mulf %74, %75 : vector<8x1xf32>
    %77 = vector.broadcast %67 : vector<8x1xf32> to vector<8x128xf32>
    %78 = arith.subf %58, %77 : vector<8x128xf32>
    %cst_44 = arith.constant 9.99999974E-6 : f32
    %79 = vector.broadcast %cst_44 : f32 to vector<8x1xf32>
    %80 = arith.addf %76, %79 : vector<8x1xf32>
    %81 = math.rsqrt %80 : vector<8x1xf32>
    %82 = vector.broadcast %81 : vector<8x1xf32> to vector<8x128xf32>
    %83 = arith.mulf %78, %82 : vector<8x128xf32>
    %84 = vector.broadcast %47 : vector<1x128xf32> to vector<8x128xf32>
    %85 = arith.mulf %83, %84 : vector<8x128xf32>
    %86 = vector.broadcast %48 : vector<1x128xf32> to vector<8x128xf32>
    %87 = arith.addf %85, %86 : vector<8x128xf32>
    %c0_45 = arith.constant 0 : index
    %c0_46 = arith.constant 0 : index
    %88 = vector.load %arg4[%c0_45, %c0_46] : memref<128x128xf32, #tpu.memory_space<vmem>>, vector<128x128xf32>
    %cst_47 = arith.constant dense<0.000000e+00> : vector<8x128xf32>
    %89 = tpu.matmul %87, %88, %cst_47 {dimension_numbers = #tpu.dot_dimension_numbers<[1], [0], [0], [1], [0, 0, 1, 1], [], []>} : vector<8x128xf32>, vector<128x128xf32>, vector<8x128xf32> -> vector<8x128xf32>
    %c3_48 = arith.constant 3 : index
    %c0_49 = arith.constant 0 : index
    %90 = vector.load %arg6[%c3_48, %c0_49] : memref<7x256xf32, #tpu.memory_space<vmem>>, vector<1x128xf32>
    %c4 = arith.constant 4 : index
    %c0_50 = arith.constant 0 : index
    %91 = vector.load %arg6[%c4, %c0_50] : memref<7x256xf32, #tpu.memory_space<vmem>>, vector<1x128xf32>
    %c5 = arith.constant 5 : index
    %c0_51 = arith.constant 0 : index
    %92 = vector.load %arg6[%c5, %c0_51] : memref<7x256xf32, #tpu.memory_space<vmem>>, vector<1x128xf32>
    %93 = vector.broadcast %90 : vector<1x128xf32> to vector<8x128xf32>
    %94 = arith.addf %89, %93 : vector<8x128xf32>
    %cst_52 = arith.constant 5.000000e-01 : f32
    %95 = vector.broadcast %cst_52 : f32 to vector<8x128xf32>
    %96 = arith.mulf %95, %94 : vector<8x128xf32>
    %cst_53 = arith.constant 0.707106769 : f32
    %97 = vector.broadcast %cst_53 : f32 to vector<8x128xf32>
    %98 = arith.mulf %94, %97 : vector<8x128xf32>
    %99 = math.erf %98 : vector<8x128xf32>
    %cst_54 = arith.constant 1.000000e+00 : f32
    %100 = vector.broadcast %cst_54 : f32 to vector<8x128xf32>
    %101 = arith.addf %100, %99 : vector<8x128xf32>
    %102 = arith.mulf %96, %101 : vector<8x128xf32>
    %103 = tpu.iota {dimensions = array<i32: 1>} : vector<8x128xi32>
    %c32_i32 = arith.constant 32 : i32
    %104 = vector.broadcast %c32_i32 : i32 to vector<8x128xi32>
    %105 = arith.cmpi slt, %103, %104 : vector<8x128xi32>
    %cst_55 = arith.constant 0.000000e+00 : f32
    %106 = vector.broadcast %cst_55 : f32 to vector<8x128xf32>
    %107 = arith.select %105, %102, %106 : vector<8x128xi1>, vector<8x128xf32>
    %cst_56 = arith.constant dense<0.000000e+00> : vector<8xf32>
    %108 = vector.multi_reduction <add>, %107, %cst_56 [1] : vector<8x128xf32> to vector<8xf32>
    %109 = vector.shape_cast %108 : vector<8xf32> to vector<8x1xf32>
    %cst_57 = arith.constant 3.125000e-02 : f32
    %110 = vector.broadcast %cst_57 : f32 to vector<8x1xf32>
    %111 = arith.mulf %109, %110 : vector<8x1xf32>
    %112 = vector.broadcast %111 : vector<8x1xf32> to vector<8x128xf32>
    %113 = arith.subf %102, %112 : vector<8x128xf32>
    %cst_58 = arith.constant 0.000000e+00 : f32
    %114 = vector.broadcast %cst_58 : f32 to vector<8x128xf32>
    %115 = arith.select %105, %113, %114 : vector<8x128xi1>, vector<8x128xf32>
    %116 = arith.mulf %115, %115 : vector<8x128xf32>
    %cst_59 = arith.constant dense<0.000000e+00> : vector<8xf32>
    %117 = vector.multi_reduction <add>, %116, %cst_59 [1] : vector<8x128xf32> to vector<8xf32>
    %118 = vector.shape_cast %117 : vector<8xf32> to vector<8x1xf32>
    %cst_60 = arith.constant 3.125000e-02 : f32
    %119 = vector.broadcast %cst_60 : f32 to vector<8x1xf32>
    %120 = arith.mulf %118, %119 : vector<8x1xf32>
    %121 = vector.broadcast %111 : vector<8x1xf32> to vector<8x128xf32>
    %122 = arith.subf %102, %121 : vector<8x128xf32>
    %cst_61 = arith.constant 9.99999974E-6 : f32
    %123 = vector.broadcast %cst_61 : f32 to vector<8x1xf32>
    %124 = arith.addf %120, %123 : vector<8x1xf32>
    %125 = math.rsqrt %124 : vector<8x1xf32>
    %126 = vector.broadcast %125 : vector<8x1xf32> to vector<8x128xf32>
    %127 = arith.mulf %122, %126 : vector<8x128xf32>
    %128 = vector.broadcast %91 : vector<1x128xf32> to vector<8x128xf32>
    %129 = arith.mulf %127, %128 : vector<8x128xf32>
    %130 = vector.broadcast %92 : vector<1x128xf32> to vector<8x128xf32>
    %131 = arith.addf %129, %130 : vector<8x128xf32>
    %c6 = arith.constant 6 : index
    %c0_62 = arith.constant 0 : index
    %132 = vector.load %arg6[%c6, %c0_62] : memref<7x256xf32, #tpu.memory_space<vmem>>, vector<1x256xf32>
    %c0_63 = arith.constant 0 : index
    %c0_64 = arith.constant 0 : index
    %133 = vector.load %arg5[%c0_63, %c0_64] : memref<128x256xf32, #tpu.memory_space<vmem>>, vector<128x256xf32>
    %cst_65 = arith.constant dense<0.000000e+00> : vector<8x256xf32>
    %134 = tpu.matmul %131, %133, %cst_65 {dimension_numbers = #tpu.dot_dimension_numbers<[1], [0], [0], [1], [0, 0, 1, 1], [], []>} : vector<8x128xf32>, vector<128x256xf32>, vector<8x256xf32> -> vector<8x256xf32>
    %135 = vector.broadcast %132 : vector<1x256xf32> to vector<8x256xf32>
    %136 = arith.addf %134, %135 : vector<8x256xf32>
    %c0_66 = arith.constant 0 : index
    %c0_67 = arith.constant 0 : index
    %137 = vector.load %arg7[%c0_66, %c0_67] : memref<8x256xf32, #tpu.memory_space<vmem>>, vector<8x256xf32>
    tpu.vector_store %arg7[%c0_66, %c0_67], %136 {strides = array<i32>} : memref<8x256xf32, #tpu.memory_space<vmem>>, vector<8x256xf32>,
    return
  }
  func.func @transform_0(%arg0: i32) -> (i32, i32, i32) {
    %c0_i32 = arith.constant 0 : i32
    %c0_i32_0 = arith.constant 0 : i32
    %c0_i32_1 = arith.constant 0 : i32
    return %c0_i32, %arg0, %c0_i32_0 : i32, i32, i32
  }
  func.func @transform_1(%arg0: i32) -> (i32, i32) {
    %c0_i32 = arith.constant 0 : i32
    %c0_i32_0 = arith.constant 0 : i32
    %c0_i32_1 = arith.constant 0 : i32
    return %c0_i32, %c0_i32_0 : i32, i32
  }
  func.func @transform_2(%arg0: i32) -> (i32, i32) {
    %c0_i32 = arith.constant 0 : i32
    %c0_i32_0 = arith.constant 0 : i32
    %c0_i32_1 = arith.constant 0 : i32
    return %c0_i32, %c0_i32_0 : i32, i32
  }
  func.func @transform_3(%arg0: i32) -> (i32, i32) {
    %c0_i32 = arith.constant 0 : i32
    %c0_i32_0 = arith.constant 0 : i32
    %c0_i32_1 = arith.constant 0 : i32
    return %c0_i32, %c0_i32_0 : i32, i32
  }
  func.func @transform_4(%arg0: i32) -> (i32, i32) {
    %c0_i32 = arith.constant 0 : i32
    %c0_i32_0 = arith.constant 0 : i32
    %c0_i32_1 = arith.constant 0 : i32
    return %c0_i32, %c0_i32_0 : i32, i32
  }
  func.func @transform_5(%arg0: i32) -> (i32, i32) {
    %c0_i32 = arith.constant 0 : i32
    %c0_i32_0 = arith.constant 0 : i32
    %c0_i32_1 = arith.constant 0 : i32
    return %c0_i32, %c0_i32_0 : i32, i32
  }
  func.func @transform_6(%arg0: i32) -> (i32, i32) {
    %c0_i32 = arith.constant 0 : i32
    %c0_i32_0 = arith.constant 0 : i32
    return %arg0, %c0_i32 : i32, i32
  }
}

</mosaic_0001>

<bundles_post_ra>
// kernel: tpu_custom_call.1
= control target key start
LH: loop header
LB: loop body
LE: loop exit
PB: predicated region body
PF: predicated region fallthrough
CT: control target
= control target key end

     0   :  { %11 = vsyncpa [#allocation3], 0  ;;  %s1905_s0 = inlined_call_operand.vmem [shape: s32[4,8,1], index: 0, kind: input, shape index: {}]   ;;  %s1906_s1 = inlined_call_operand.vmem [shape: f32[256,32], index: 1, kind: input, shape index: {}]   ;;  %s1907_s2 = inlined_call_operand.hbm [shape: f32[128,128], index: 2, kind: input, shape index: {}]   ;;  %s1908_s3 = inlined_call_operand.hbm [shape: f32[128,128], index: 3, kind: input, shape index: {}]   ;;  %s1909_s4 = inlined_call_operand.vmem [shape: f32[128,256], index: 4, kind: input, shape index: {}]   ;;  %s1910_s5 = inlined_call_operand.vmem [shape: f32[7,256], index: 5, kind: input, shape index: {}]   ;;  %s1911_s6 = inlined_call_operand.hbm [shape: f32[8,256], index: 6, kind: output, shape index: {}]  }
   0x1   :  { %12 = vsyncpa [#allocation6], 0 }
   0x2   :  { %13 = vsyncpa [#allocation4], 0  ;;  %s1355_s21 = smov [#allocation2]  }
   0x3   :  { %s23_s22 = sshll.u32 %s1355_s21, 4  ;;  %s24_s22 = int_to_ptr.vmem [resolvable:$true] %s23_s22 }
   0x4   :  { %s1297_s23 = scalar_lea.vmem %s24_s22, 2048  ;;  %p1302_p1 = scmp.lt.s32.totalorder %s24_s22, %s24_s22 }
   0x5   :  { %p1298_p0 = scmp.ne.s32.totalorder %s24_s22, %s1297_s23  ;;  %p1303_p2 = scmp.lt.s32.totalorder %s1297_s23, %s1297_s23 }
   0x7   :  { %p1304_p3 = por %p1303_p2, %p1302_p1 }
   0x9   :  { %p1305_p4 = pnand %p1304_p3, %p1298_p0 }
   0xb   :  { %1308 = shalt.err (!%p1305_p4)
}
   0xc   :  { %s1356_s24 = smov 128   ;;  %s1357_s25 = smov 8  }
   0xd   :  { %29 = dma.hbm_to_vmem [thread:$0]  %s1907_s2, 2048, %s24_s22, [#allocation3], %s1356_s24, %s1356_s24, %s1357_s25  }
   0xe   :  { %s1358_s28 = smov [#allocation5]  }
   0xf   :  { %s35_s29 = sshll.u32 %s1358_s28, 4  ;;  %s36_s29 = int_to_ptr.vmem [resolvable:$true] %s35_s29 }
  0x10   :  { %s1317_s30 = scalar_lea.vmem %s36_s29, 2048  ;;  %p1322_p6 = scmp.lt.s32.totalorder %s36_s29, %s36_s29 }
  0x11   :  { %p1318_p5 = scmp.ne.s32.totalorder %s36_s29, %s1317_s30  ;;  %p1323_p7 = scmp.lt.s32.totalorder %s1317_s30, %s1317_s30 }
  0x13   :  { %p1324_p8 = por %p1323_p7, %p1322_p6 }
  0x15   :  { %p1325_p9 = pnand %p1324_p8, %p1318_p5 }
  0x17   :  { %1328 = shalt.err (!%p1325_p9)
}
  0x18   :  { %41 = dma.hbm_to_vmem [thread:$0]  %s1908_s3, 2048, %s36_s29, [#allocation6], %s1356_s24, %s1356_s24, %s1357_s25  }
  0x19   :  { %1349 = dma.done.wait [#allocation3], 2048  }
  0x1a   :  { %1350 = vsyncadd [#allocation3], 4294965248 }
  0x1b   :  { %1351 = dma.done.wait [#allocation6], 2048  }
  0x1c   :  { %1352 = vsyncadd [#allocation6], 4294965248  ;;  %v1359_v0 = vmov 0   ;;  %v994_v1 = vld [vmem:[%s1905_s0 + $0x8] sm:$0xff]  ;;  %v1411_v2 = vld [vmem:[%s1906_s1 + $0xf8] sm:$0xff]  ;;  %v1360_v37 = vmov 0.0   ;;  %v52_v38 = vlaneseq }
  0x1d   :  { %1279 = vset.pattern.permute.xlu0 %v1359_v0  ;;  %1280 = vset.pattern.permute.xlu1 %v1359_v0  ;;  %v1417_v3 = vld [vmem:[%s1906_s1 + $0x78] sm:$0xff]  ;;  %v1422_v4 = vld [vmem:[%s1906_s1 + $0xf0] sm:$0xff]  ;;  %v55_v6 = vld [vmem:[%s1905_s0] sm:$0xff]  ;;  %v1361_v42 = vmov 1.0   ;;  %vm1362_vm4 = vmmov 0   ;;  %vm256_vm5 = vcmask 261120  }
  0x1e   :  { %174 = vperm.xlu0 %1279, %v994_v1   ;;  %1049 = vmatprep.subr.mxu1 %v1411_v2  ;;  %v1427_v5 = vld [vmem:[%s1906_s1 + $0x70] sm:$0xff]  ;;  %v1437_v7 = vld [vmem:[%s1906_s1 + $0xe8] sm:$0xff]  ;;  %v1451_v9 = vld [vmem:[%s1906_s1 + $0xe0] sm:$0xff]  ;;  %v1644_v39 = vand.u32 127, %v52_v38  ;;  %s1363_s20 = smov [#allocation7]  }
  0x1f   :  { %1050 = vmatpush3.msra.mxu1 %v1417_v3  ;;  %1014 = vmatprep.subr.mxu0 %v1411_v2  ;;  %v1444_v8 = vld [vmem:[%s1906_s1 + $0x68] sm:$0xff]  ;;  %v1457_v10 = vld [vmem:[%s1906_s1 + $0x60] sm:$0xff]  ;;  %v1464_v11 = vld [vmem:[%s1906_s1 + $0xd8] sm:$0xff]  ;;  %s980_s21 = sshll.u32 %s1363_s20, 4  ;;  %s981_s21 = int_to_ptr.vmem [resolvable:$true] %s980_s21 }
  0x20   :  { %1051 = vmatprep.subr.mxu1 %v1422_v4  ;;  %1015 = vmatpush3.msra.mxu0 %v1417_v3  ;;  %v1471_v12 = vld [vmem:[%s1906_s1 + $0x58] sm:$0xff]  ;;  %v1478_v13 = vld [vmem:[%s1906_s1 + $0xd0] sm:$0xff]  ;;  %v1492_v15 = vld [vmem:[%s1906_s1 + $0xc8] sm:$0xff]  ;;  %v1647_v40 = vadd.s32 128, %v1644_v39  ;;  %vm730_vm10 = vcmp.lt.s32.totalorder %v1644_v39, 64  ;;  %vm840_vm11 = vcmp.lt.s32.totalorder %v1644_v39, 32  ;;  %p1334_p11 = scmp.lt.s32.totalorder %s981_s21, %s981_s21 }
  0x21   :  { %1052 = vmatpush3.msra.mxu1 %v1427_v5  ;;  %1016 = vmatprep.subr.mxu0 %v1422_v4  ;;  %v1485_v14 = vld [vmem:[%s1906_s1 + $0x50] sm:$0xff]  ;;  %v1499_v16 = vld [vmem:[%s1906_s1 + $0x48] sm:$0xff]  ;;  %v1506_v17 = vld [vmem:[%s1906_s1 + $0xc0] sm:$0xff]  ;;  %s1329_s22 = scalar_lea.vmem %s981_s21, 256 }
  0x22   :  { %57 = vperm.xlu0 %1279, %v55_v6   ;;  %1053 = vmatprep.subr.mxu1 %v1437_v7  ;;  %v1513_v18 = vld [vmem:[%s1906_s1 + $0x40] sm:$0xff]  ;;  %v1520_v19 = vld [vmem:[%s1906_s1 + $0xb8] sm:$0xff]  ;;  %v1534_v21 = vld [vmem:[%s1906_s1 + $0xb0] sm:$0xff]  ;;  %p1330_p10 = scmp.ne.s32.totalorder %s981_s21, %s1329_s22  ;;  %p1335_p12 = scmp.lt.s32.totalorder %s1329_s22, %s1329_s22 }
  0x23   :  { %1054 = vmatpush3.msra.mxu1 %v1444_v8  ;;  %1017 = vmatpush3.msra.mxu0 %v1427_v5  ;;  %v1527_v20 = vld [vmem:[%s1906_s1 + $0x38] sm:$0xff]  ;;  %v1541_v22 = vld [vmem:[%s1906_s1 + $0x30] sm:$0xff]  ;;  %v1548_v23 = vld [vmem:[%s1906_s1 + $0xa8] sm:$0xff] }
  0x24   :  { %1055 = vmatprep.subr.mxu1 %v1451_v9  ;;  %1018 = vmatprep.subr.mxu0 %v1437_v7  ;;  %v1555_v24 = vld [vmem:[%s1906_s1 + $0x28] sm:$0xff]  ;;  %v1562_v25 = vld [vmem:[%s1906_s1 + $0xa0] sm:$0xff]  ;;  %v1576_v27 = vld [vmem:[%s1906_s1 + $0x98] sm:$0xff]  ;;  %p1336_p13 = por %p1335_p12, %p1334_p11 }
  0x25   :  { %1056 = vmatpush3.msra.mxu1 %v1457_v10  ;;  %1019 = vmatpush3.msra.mxu0 %v1444_v8  ;;  %v1569_v26 = vld [vmem:[%s1906_s1 + $0x20] sm:$0xff]  ;;  %v1583_v28 = vld [vmem:[%s1906_s1 + $0x18] sm:$0xff]  ;;  %v1590_v29 = vld [vmem:[%s1906_s1 + $0x90] sm:$0xff] }
  0x26   :  { %1057 = vmatprep.subr.mxu1 %v1464_v11  ;;  %1020 = vmatprep.subr.mxu0 %v1451_v9  ;;  %v1597_v30 = vld [vmem:[%s1906_s1 + $0x10] sm:$0xff]  ;;  %v1604_v31 = vld [vmem:[%s1906_s1 + $0x88] sm:$0xff]  ;;  %v1618_v33 = vld [vmem:[%s1906_s1 + $0x80] sm:$0xff]  ;;  %p1337_p0 = pnand %p1336_p13, %p1330_p10 }
  0x27   :  { %1058 = vmatpush3.msra.mxu1 %v1471_v12  ;;  %1021 = vmatpush3.msra.mxu0 %v1457_v10  ;;  %v1611_v32 = vld [vmem:[%s1906_s1 + $0x8] sm:$0xff]  ;;  %v1625_v34 = vld [vmem:[%s1906_s1] sm:$0xff]  ;;  %v1001_v35 = vld [vmem:[%s1905_s0 + $0x10] sm:$0xff] }
  0x28   :  { %1059 = vmatprep.subr.mxu1 %v1478_v13  ;;  %1022 = vmatprep.subr.mxu0 %v1464_v11  ;;  %v1007_v36 = vld [vmem:[%s1905_s0 + $0x18] sm:$0xff]  ;;  %v254_v45 = vld [vmem:[#allocation2 + $0x30] sm:$0xff]  ;;  %v253_v46 = vld [vmem:[#allocation2 + $0x28] sm:$0xff] }
  0x29   :  { %1060 = vmatpush3.msra.mxu1 %v1485_v14  ;;  %1023 = vmatpush3.msra.mxu0 %v1471_v12  ;;  %v255_v44 = vld [vmem:[#allocation2 + $0x38] sm:$0xff]  ;;  %v252_v48 = vld [vmem:[#allocation2 + $0x20] sm:$0xff]  ;;  %v169_v49 = vld [vmem:[#allocation2 + $0x10] sm:$0xff] }
  0x2a   :  { %1061 = vmatprep.subr.mxu1 %v1492_v15  ;;  %1024 = vmatprep.subr.mxu0 %v1478_v13  ;;  %v170_v47 = vld [vmem:[#allocation2 + $0x18] sm:$0xff]  ;;  %v168_v50 = vld [vmem:[#allocation2 + $0x8] sm:$0xff]  ;;  %v167_v51 = vld [vmem:[#allocation2] sm:$0xff] }
  0x2b   :  { %1062 = vmatpush3.msra.mxu1 %v1499_v16  ;;  %1025 = vmatpush3.msra.mxu0 %v1485_v14  ;;  %v487_v59 = vld [vmem:[#allocation2 + $0x58] sm:$0xff]  ;;  %v486_v60 = vld [vmem:[#allocation2 + $0x50] sm:$0xff]  ;;  %v485_v61 = vld [vmem:[#allocation2 + $0x48] sm:$0xff] }
  0x2c   :  { %1063 = vmatprep.subr.mxu1 %v1506_v17  ;;  %1026 = vmatprep.subr.mxu0 %v1492_v15  ;;  %v484_v62 = vld [vmem:[#allocation2 + $0x40] sm:$0xff] }
  0x2d   :  { %1064 = vmatpush3.msra.mxu1 %v1513_v18  ;;  %1027 = vmatpush3.msra.mxu0 %v1499_v16 }
  0x2e   :  { %1065 = vmatprep.subr.mxu1 %v1520_v19  ;;  %1028 = vmatprep.subr.mxu0 %v1506_v17 }
  0x2f   :  { %1066 = vmatpush3.msra.mxu1 %v1527_v20  ;;  %1029 = vmatpush3.msra.mxu0 %v1513_v18 }
  0x30   :  { %1067 = vmatprep.subr.mxu1 %v1534_v21  ;;  %1030 = vmatprep.subr.mxu0 %v1520_v19 }
  0x31   :  { %1068 = vmatpush3.msra.mxu1 %v1541_v22  ;;  %1031 = vmatpush3.msra.mxu0 %v1527_v20 }
  0x32   :  { %1069 = vmatprep.subr.mxu1 %v1548_v23  ;;  %1032 = vmatprep.subr.mxu0 %v1534_v21 }
  0x33   :  { %1070 = vmatpush3.msra.mxu1 %v1555_v24  ;;  %1033 = vmatpush3.msra.mxu0 %v1541_v22 }
  0x34   :  { %1071 = vmatprep.subr.mxu1 %v1562_v25  ;;  %1034 = vmatprep.subr.mxu0 %v1548_v23 }
  0x35   :  { %1072 = vmatpush3.msra.mxu1 %v1569_v26  ;;  %1035 = vmatpush3.msra.mxu0 %v1555_v24 }
  0x36   :  { %1073 = vmatprep.subr.mxu1 %v1576_v27  ;;  %1036 = vmatprep.subr.mxu0 %v1562_v25 }
  0x37   :  { %1074 = vmatpush3.msra.mxu1 %v1583_v28  ;;  %1037 = vmatpush3.msra.mxu0 %v1569_v26 }
  0x38   :  { %1075 = vmatprep.subr.mxu1 %v1590_v29  ;;  %1038 = vmatprep.subr.mxu0 %v1576_v27 }
  0x39   :  { %1076 = vmatpush3.msra.mxu1 %v1597_v30  ;;  %1039 = vmatpush3.msra.mxu0 %v1583_v28 }
  0x3a   :  { %1077 = vmatprep.subr.mxu1 %v1604_v31  ;;  %1040 = vmatprep.subr.mxu0 %v1590_v29 }
  0x3b   :  { %1078 = vmatpush3.msra.mxu1 %v1611_v32  ;;  %1041 = vmatpush3.msra.mxu0 %v1597_v30 }
  0x3c   :  { %1079 = vmatprep.subr.mxu1 %v1618_v33  ;;  %1042 = vmatprep.subr.mxu0 %v1604_v31 }
  0x3d   :  { %1080 = vmatpush3.msra.mxu1 %v1625_v34  ;;  %1043 = vmatpush3.msra.mxu0 %v1611_v32 }
  0x3e   :  { %1044 = vmatprep.subr.mxu0 %v1618_v33  ;;  %406 = vperm.xlu1 %1280, %v1001_v35  }
  0x3f   :  { %1045 = vmatpush3.msra.mxu0 %v1625_v34  ;;  %1202 = vmatprep.subr.mxu1 %v1360_v37 }
  0x40   :  { %1191 = vmatprep.subr.mxu0 %v1360_v37 }
  0x42   :  { %565 = vperm.xlu1 %1280, %v1007_v36  }
  0x99   :  { %v175_v41 = vpop.permute.xlu0 %174 }
  0x9a   :  { %vm176_vm0 = vcmp.eq.s32.totalorder %v1644_v39, %v175_v41  ;;  %vm177_vm1 = vcmp.eq.s32.totalorder %v1647_v40, %v175_v41 }
  0x9b   :  { %997 = vmatprep.mubr.msk.f32.mxu1 %vm177_vm1, %v1361_v42 }
  0x9c   :  { %998 = vmatmul.mubr.msk.f32.vlgmr.msra.gmra.mxu1 %vm176_vm0, %v1361_v42 }
  0x9d   :  { %v58_v43 = vpop.permute.xlu0 %57  ;;  %1203 = vmatpush3.msra.mxu1 %v170_v47  ;;  %1210 = vmatprep.mubr.msk.f32.mxu1 %vm1362_vm4, %v1360_v37  ;;  %v751_v47 = vld [vmem:[#allocation5 + $0x28] sm:$0xff] }
  0x9e   :  { %vm59_vm2 = vcmp.eq.s32.totalorder %v1644_v39, %v58_v43  ;;  %vm60_vm3 = vcmp.eq.s32.totalorder %v1647_v40, %v58_v43  ;;  %1204 = vmatprep.subr.mxu1 %v1360_v37 }
  0x9f   :  { %992 = vmatprep.mubr.msk.f32.mxu0 %vm60_vm3, %v1361_v42  ;;  %1205 = vmatpush3.msra.mxu1 %v169_v49  ;;  %v749_v49 = vld [vmem:[#allocation5 + $0x18] sm:$0xff] }
  0xa0   :  { %993 = vmatmul.mubr.msk.f32.vlgmr.msra.gmra.mxu0 %vm59_vm2, %v1361_v42  ;;  %1206 = vmatprep.subr.mxu1 %v1360_v37 }
  0xa1   :  { %1192 = vmatpush3.msra.mxu0 %v255_v44  ;;  %1199 = vmatprep.mubr.msk.f32.mxu0 %vm1362_vm4, %v1360_v37 }
  0xa2   :  { %1193 = vmatprep.subr.mxu0 %v1360_v37  ;;  %1207 = vmatpush3.msra.mxu1 %v168_v50  ;;  %v748_v50 = vld [vmem:[#allocation5 + $0x10] sm:$0xff] }
  0xa3   :  { %1194 = vmatpush3.msra.mxu0 %v254_v45  ;;  %1208 = vmatprep.subr.mxu1 %v1360_v37  ;;  %v753_v45 = vld [vmem:[#allocation5 + $0x38] sm:$0xff] }
  0xa4   :  { %1195 = vmatprep.subr.mxu0 %v1360_v37  ;;  %1209 = vmatpush3.msra.mxu1 %v167_v51  ;;  %v747_v51 = vld [vmem:[#allocation5 + $0x8] sm:$0xff] }
  0xa5   :  { %1196 = vmatpush3.msra.mxu0 %v253_v46  ;;  %1213 = vmatprep.subr.mxu1 %v1360_v37  ;;  %v752_v46 = vld [vmem:[#allocation5 + $0x30] sm:$0xff] }
  0xa6   :  { %1197 = vmatprep.subr.mxu0 %v1360_v37 }
  0xa7   :  { %1198 = vmatpush3.msra.mxu0 %v252_v48  ;;  %v750_v48 = vld [vmem:[#allocation5 + $0x20] sm:$0xff] }
  0xa8   :  { %1094 = vmatprep.subr.mxu0 %v1411_v2 }
  0xb9   :  { %v407_v54 = vpop.permute.xlu1 %406 }
  0xba   :  { %vm409_vm6 = vcmp.eq.s32.totalorder %v1647_v40, %v407_v54  ;;  %vm408_vm7 = vcmp.eq.s32.totalorder %v1644_v39, %v407_v54 }
  0xbd   :  { %v566_v41 = vpop.permute.xlu1 %565 }
  0xbe   :  { %vm568_vm8 = vcmp.eq.s32.totalorder %v1647_v40, %v566_v41  ;;  %vm567_vm9 = vcmp.eq.s32.totalorder %v1644_v39, %v566_v41  ;;  %v755_v40 = vld [vmem:[#allocation5 + $0x48] sm:$0xff]  ;;  %v878_v39 = vld [vmem:[%s1909_s4 + $0xa0] sm:$0xff] }
 0x15c   :  { %v1081_v52 = vpop.f32.mrf.mxu1 }
 0x15e   :  { %v1082_v53 = vpop.f32.mrf.mxu1 }
 0x15f   :  { %v1083_v55 = vadd.f32 %v1082_v53, %v1081_v52  ;;  %v746_v52 = vld [vmem:[#allocation5] sm:$0xff] }
 0x160   :  { %v1046_v56 = vpop.f32.mrf.mxu0 }
 0x161   :  { %1200 = vmatmul.mubr.msk.f32.vlgmr.msra.gmra.mxu0 %vm256_vm5, %v1083_v55 }
 0x162   :  { %1095 = vmatpush3.msra.mxu0 %v1417_v3  ;;  %v1047_v57 = vpop.f32.mrf.mxu0  ;;  %1004 = vmatprep.mubr.msk.f32.mxu0 %vm409_vm6, %v1361_v42 }
 0x163   :  { %v1048_v58 = vadd.f32 %v1047_v57, %v1046_v56  ;;  %1096 = vmatprep.subr.mxu0 %v1422_v4  ;;  %v722_v57 = vld [vmem:[%s1910_s5 + $0x1] ss:$0 sm:$0xff] }
 0x164   :  { %1097 = vmatpush3.msra.mxu0 %v1427_v5 }
 0x165   :  { %1098 = vmatprep.subr.mxu0 %v1437_v7  ;;  %1211 = vmatmul.mubr.msk.f32.vlgmr.msra.gmra.mxu1 %vm256_vm5, %v1048_v58 }
 0x166   :  { %1099 = vmatpush3.msra.mxu0 %v1444_v8  ;;  %1221 = vmatprep.mubr.msk.f32.mxu1 %vm1362_vm4, %v1360_v37 }
 0x167   :  { %1100 = vmatprep.subr.mxu0 %v1451_v9  ;;  %1214 = vmatpush3.msra.mxu1 %v487_v59  ;;  %v723_v59 = vld [vmem:[%s1910_s5 + $0x2] ss:$0 sm:$0xff] }
 0x168   :  { %1101 = vmatpush3.msra.mxu0 %v1457_v10  ;;  %1215 = vmatprep.subr.mxu1 %v1360_v37 }
 0x169   :  { %1102 = vmatprep.subr.mxu0 %v1464_v11  ;;  %1216 = vmatpush3.msra.mxu1 %v486_v60 }
 0x16a   :  { %1103 = vmatpush3.msra.mxu0 %v1471_v12  ;;  %1217 = vmatprep.subr.mxu1 %v1360_v37 }
 0x16b   :  { %1104 = vmatprep.subr.mxu0 %v1478_v13  ;;  %1218 = vmatpush3.msra.mxu1 %v485_v61 }
 0x16c   :  { %1105 = vmatpush3.msra.mxu0 %v1485_v14  ;;  %1219 = vmatprep.subr.mxu1 %v1360_v37 }
 0x16d   :  { %1106 = vmatprep.subr.mxu0 %v1492_v15  ;;  %1220 = vmatpush3.msra.mxu1 %v484_v62 }
 0x16e   :  { %1107 = vmatpush3.msra.mxu0 %v1499_v16  ;;  %1134 = vmatprep.subr.mxu1 %v1411_v2  ;;  %v646_v2 = vld [vmem:[#allocation2 + $0x78] sm:$0xff] }
 0x16f   :  { %1108 = vmatprep.subr.mxu0 %v1506_v17 }
 0x170   :  { %1109 = vmatpush3.msra.mxu0 %v1513_v18 }
 0x171   :  { %1110 = vmatprep.subr.mxu0 %v1520_v19 }
 0x172   :  { %1111 = vmatpush3.msra.mxu0 %v1527_v20 }
 0x173   :  { %1112 = vmatprep.subr.mxu0 %v1534_v21 }
 0x174   :  { %1113 = vmatpush3.msra.mxu0 %v1541_v22 }
 0x175   :  { %1114 = vmatprep.subr.mxu0 %v1548_v23 }
 0x176   :  { %1115 = vmatpush3.msra.mxu0 %v1555_v24 }
 0x177   :  { %1116 = vmatprep.subr.mxu0 %v1562_v25 }
 0x178   :  { %1117 = vmatpush3.msra.mxu0 %v1569_v26 }
 0x179   :  { %1118 = vmatprep.subr.mxu0 %v1576_v27 }
 0x17a   :  { %1119 = vmatpush3.msra.mxu0 %v1583_v28 }
 0x17b   :  { %1120 = vmatprep.subr.mxu0 %v1590_v29 }
 0x17c   :  { %1121 = vmatpush3.msra.mxu0 %v1597_v30 }
 0x17d   :  { %1122 = vmatprep.subr.mxu0 %v1604_v31 }
 0x17e   :  { %1123 = vmatpush3.msra.mxu0 %v1611_v32 }
 0x17f   :  { %1124 = vmatprep.subr.mxu0 %v1618_v33 }
 0x180   :  { %1125 = vmatpush3.msra.mxu0 %v1625_v34 }
 0x181   :  { %1005 = vmatmul.mubr.msk.f32.vlgmr.msra.gmra.mxu0 %vm408_vm7, %v1361_v42  ;;  %1224 = vmatprep.subr.mxu0 %v1360_v37 }
 0x182   :  { %1232 = vmatprep.mubr.msk.f32.mxu0 %vm1362_vm4, %v1360_v37  ;;  %1225 = vmatpush3.msra.mxu0 %v646_v2  ;;  %v888_v2 = vld [vmem:[%s1909_s4 + $0xf0] sm:$0xff] }
 0x183   :  { %1226 = vmatprep.subr.mxu0 %v1360_v37 }
 0x221   :  { %v326_v63 = vpop.f32.mrf.mxu0 }
 0x223   :  { %v1201_v0 = vpop.f32.mrf.mxu0 }
 0x225   :  { %v399_v1 = vpop.f32.mrf.mxu1 }
 0x226   :  { %v400_v6 = vadd.f32 %v399_v1, %v326_v63 }
 0x227   :  { %v1212_v35 = vpop.f32.mrf.mxu1 }
 0x241   :  { %v1126_v36 = vpop.f32.mrf.mxu0 }
 0x243   :  { %v1127_v43 = vpop.f32.mrf.mxu0 }
 0x244   :  { %v1128_v44 = vadd.f32 %v1127_v43, %v1126_v36 }
 0x246   :  { %1222 = vmatmul.mubr.msk.f32.vlgmr.msra.gmra.mxu1 %vm256_vm5, %v1128_v44  ;;  %v889_v44 = vld [vmem:[%s1909_s4 + $0xf8] sm:$0xff] }
 0x247   :  { %1135 = vmatpush3.msra.mxu1 %v1417_v3  ;;  %1010 = vmatprep.mubr.msk.f32.mxu1 %vm568_vm8, %v1361_v42  ;;  %v645_v3 = vld [vmem:[#allocation2 + $0x70] sm:$0xff] }
 0x248   :  { %1136 = vmatprep.subr.mxu1 %v1422_v4  ;;  %1227 = vmatpush3.msra.mxu0 %v645_v3  ;;  %v644_v4 = vld [vmem:[#allocation2 + $0x68] sm:$0xff] }
 0x249   :  { %1137 = vmatpush3.msra.mxu1 %v1427_v5  ;;  %1228 = vmatprep.subr.mxu0 %v1360_v37  ;;  %v643_v5 = vld [vmem:[#allocation2 + $0x60] sm:$0xff]  ;;  %v887_v3 = vld [vmem:[%s1909_s4 + $0xe8] sm:$0xff] }
 0x24a   :  { %1138 = vmatprep.subr.mxu1 %v1437_v7  ;;  %1229 = vmatpush3.msra.mxu0 %v644_v4  ;;  %v886_v4 = vld [vmem:[%s1909_s4 + $0xe0] sm:$0xff] }
 0x24b   :  { %1139 = vmatpush3.msra.mxu1 %v1444_v8  ;;  %1230 = vmatprep.subr.mxu0 %v1360_v37 }
 0x24c   :  { %1140 = vmatprep.subr.mxu1 %v1451_v9  ;;  %1231 = vmatpush3.msra.mxu0 %v643_v5  ;;  %v885_v5 = vld [vmem:[%s1909_s4 + $0xd8] sm:$0xff] }
 0x24d   :  { %1141 = vmatpush3.msra.mxu1 %v1457_v10  ;;  %1235 = vmatprep.subr.mxu0 %v1360_v37 }
 0x24e   :  { %1142 = vmatprep.subr.mxu1 %v1464_v11 }
 0x24f   :  { %1143 = vmatpush3.msra.mxu1 %v1471_v12 }
 0x250   :  { %1144 = vmatprep.subr.mxu1 %v1478_v13 }
 0x251   :  { %1145 = vmatpush3.msra.mxu1 %v1485_v14  ;;  %v721_v14 = vld [vmem:[%s1910_s5] ss:$0 sm:$0xff] }
 0x252   :  { %1146 = vmatprep.subr.mxu1 %v1492_v15 }
 0x253   :  { %1147 = vmatpush3.msra.mxu1 %v1499_v16 }
 0x254   :  { %1148 = vmatprep.subr.mxu1 %v1506_v17 }
 0x255   :  { %1149 = vmatpush3.msra.mxu1 %v1513_v18 }
 0x256   :  { %1150 = vmatprep.subr.mxu1 %v1520_v19 }
 0x257   :  { %1151 = vmatpush3.msra.mxu1 %v1527_v20 }
 0x258   :  { %1152 = vmatprep.subr.mxu1 %v1534_v21 }
 0x259   :  { %1153 = vmatpush3.msra.mxu1 %v1541_v22 }
 0x25a   :  { %1154 = vmatprep.subr.mxu1 %v1548_v23 }
 0x25b   :  { %1155 = vmatpush3.msra.mxu1 %v1555_v24  ;;  %v761_v24 = vld [vmem:[#allocation5 + $0x78] sm:$0xff] }
 0x25c   :  { %1156 = vmatprep.subr.mxu1 %v1562_v25  ;;  %v760_v25 = vld [vmem:[#allocation5 + $0x70] sm:$0xff] }
 0x25d   :  { %1157 = vmatpush3.msra.mxu1 %v1569_v26  ;;  %v759_v26 = vld [vmem:[#allocation5 + $0x68] sm:$0xff] }
 0x25e   :  { %1158 = vmatprep.subr.mxu1 %v1576_v27  ;;  %v758_v27 = vld [vmem:[#allocation5 + $0x60] sm:$0xff] }
 0x25f   :  { %1159 = vmatpush3.msra.mxu1 %v1583_v28 }
 0x260   :  { %1160 = vmatprep.subr.mxu1 %v1590_v29 }
 0x261   :  { %1161 = vmatpush3.msra.mxu1 %v1597_v30 }
 0x262   :  { %1162 = vmatprep.subr.mxu1 %v1604_v31 }
 0x263   :  { %1163 = vmatpush3.msra.mxu1 %v1611_v32 }
 0x264   :  { %1164 = vmatprep.subr.mxu1 %v1618_v33  ;;  %v757_v33 = vld [vmem:[#allocation5 + $0x58] sm:$0xff] }
 0x265   :  { %1165 = vmatpush3.msra.mxu1 %v1625_v34  ;;  %v756_v34 = vld [vmem:[#allocation5 + $0x50] sm:$0xff] }
 0x266   :  { %1011 = vmatmul.mubr.msk.f32.vlgmr.msra.gmra.mxu1 %vm567_vm9, %v1361_v42  ;;  %v754_v42 = vld [vmem:[#allocation5 + $0x40] sm:$0xff]  ;;  %901 = vmatprep.subr.mxu1 %v889_v44 }
 0x267   :  { %965 = vmatprep.mubr.f32.mxu1 %v1360_v37  ;;  %902 = vmatpush1.msra.mxu1 %v888_v2 }
 0x268   :  { %903 = vmatprep.subr.mxu1 %v887_v3 }
 0x269   :  { %904 = vmatpush1.msra.mxu1 %v886_v4 }
 0x26a   :  { %905 = vmatprep.subr.mxu1 %v885_v5 }
 0x306   :  { %v557_v7 = vpop.f32.mrf.mxu1 }
 0x307   :  { %v561_v8 = vadd.f32 %v557_v7, %v400_v6  ;;  %v884_v7 = vld [vmem:[%s1909_s4 + $0xd0] sm:$0xff] }
 0x308   :  { %v1223_v9 = vpop.f32.mrf.mxu1  ;;  %906 = vmatpush1.msra.mxu1 %v884_v7 }
 0x309   :  { %v882_v9 = vld [vmem:[%s1909_s4 + $0xc0] sm:$0xff] }
 0x326   :  { %v1166_v10 = vpop.f32.mrf.mxu1 }
 0x328   :  { %v1167_v11 = vpop.f32.mrf.mxu1 }
 0x329   :  { %v1168_v12 = vadd.f32 %v1167_v11, %v1166_v10 }
 0x32b   :  { %1233 = vmatmul.mubr.msk.f32.vlgmr.msra.gmra.mxu0 %vm256_vm5, %v1168_v12 }
 0x32c   :  { %1267 = vmatprep.mubr.msk.f32.mxu0 %vm1362_vm4, %v1360_v37  ;;  %1236 = vmatpush3.msra.mxu0 %v761_v24  ;;  %v871_v24 = vld [vmem:[%s1909_s4 + $0x68] sm:$0xff] }
 0x32d   :  { %1237 = vmatprep.subr.mxu0 %v1360_v37 }
 0x32e   :  { %1238 = vmatpush3.msra.mxu0 %v760_v25  ;;  %v870_v25 = vld [vmem:[%s1909_s4 + $0x60] sm:$0xff] }
 0x32f   :  { %1239 = vmatprep.subr.mxu0 %v1360_v37 }
 0x330   :  { %1240 = vmatpush3.msra.mxu0 %v759_v26  ;;  %v869_v26 = vld [vmem:[%s1909_s4 + $0x58] sm:$0xff] }
 0x331   :  { %1241 = vmatprep.subr.mxu0 %v1360_v37 }
 0x332   :  { %1242 = vmatpush3.msra.mxu0 %v758_v27  ;;  %v868_v27 = vld [vmem:[%s1909_s4 + $0x50] sm:$0xff] }
 0x333   :  { %1243 = vmatprep.subr.mxu0 %v1360_v37 }
 0x334   :  { %1244 = vmatpush3.msra.mxu0 %v757_v33  ;;  %v862_v33 = vld [vmem:[%s1909_s4 + $0x20] sm:$0xff] }
 0x335   :  { %1245 = vmatprep.subr.mxu0 %v1360_v37 }
 0x336   :  { %1246 = vmatpush3.msra.mxu0 %v756_v34  ;;  %v861_v34 = vld [vmem:[%s1909_s4 + $0x18] sm:$0xff] }
 0x337   :  { %1247 = vmatprep.subr.mxu0 %v1360_v37 }
 0x338   :  { %1248 = vmatpush3.msra.mxu0 %v755_v40  ;;  %v860_v40 = vld [vmem:[%s1909_s4 + $0x10] sm:$0xff] }
 0x339   :  { %1249 = vmatprep.subr.mxu0 %v1360_v37 }
 0x33a   :  { %1250 = vmatpush3.msra.mxu0 %v754_v42  ;;  %v859_v42 = vld [vmem:[%s1909_s4 + $0x8] sm:$0xff] }
 0x33b   :  { %1251 = vmatprep.subr.mxu0 %v1360_v37 }
 0x33c   :  { %1252 = vmatpush3.msra.mxu0 %v753_v45  ;;  %v858_v45 = vld [vmem:[%s1909_s4] sm:$0xff] }
 0x33d   :  { %1253 = vmatprep.subr.mxu0 %v1360_v37 }
 0x33e   :  { %1254 = vmatpush3.msra.mxu0 %v752_v46 }
 0x33f   :  { %1255 = vmatprep.subr.mxu0 %v1360_v37 }
 0x340   :  { %1256 = vmatpush3.msra.mxu0 %v751_v47 }
 0x341   :  { %1257 = vmatprep.subr.mxu0 %v1360_v37 }
 0x342   :  { %1258 = vmatpush3.msra.mxu0 %v750_v48 }
 0x343   :  { %1259 = vmatprep.subr.mxu0 %v1360_v37 }
 0x344   :  { %1260 = vmatpush3.msra.mxu0 %v749_v49 }
 0x345   :  { %1261 = vmatprep.subr.mxu0 %v1360_v37 }
 0x346   :  { %1262 = vmatpush3.msra.mxu0 %v748_v50  ;;  %v763_v50 = vld [vmem:[%s1910_s5 + $0x4] ss:$0 sm:$0xff] }
 0x347   :  { %1263 = vmatprep.subr.mxu0 %v1360_v37 }
 0x348   :  { %1264 = vmatpush3.msra.mxu0 %v747_v51 }
 0x349   :  { %1265 = vmatprep.subr.mxu0 %v1360_v37  ;;  %v762_v37 = vld [vmem:[%s1910_s5 + $0x3] ss:$0 sm:$0xff] }
 0x34a   :  { %1266 = vmatpush3.msra.mxu0 %v746_v52  ;;  %v764_v52 = vld [vmem:[%s1910_s5 + $0x5] ss:$0 sm:$0xff] }
 0x3eb   :  { %v716_v13 = vpop.f32.mrf.mxu0 }
 0x3ec   :  { %v720_v15 = vadd.f32 %v716_v13, %v561_v8  ;;  %v883_v8 = vld [vmem:[%s1909_s4 + $0xc8] sm:$0xff] }
 0x3ed   :  { %v1234_v16 = vpop.f32.mrf.mxu0  ;;  %907 = vmatprep.subr.mxu1 %v883_v8 }
 0x3ee   :  { %v724_v17 = vadd.f32 %v721_v14, %v720_v15  ;;  %908 = vmatpush1.msra.mxu1 %v882_v9  ;;  %v881_v15 = vld [vmem:[%s1909_s4 + $0xb8] sm:$0xff]  ;;  %v880_v16 = vld [vmem:[%s1909_s4 + $0xb0] sm:$0xff] }
 0x3ef   :  { %909 = vmatprep.subr.mxu1 %v881_v15 }
 0x3f0   :  { %v726_v18 = vmul.f32 0.70710677, %v724_v17  ;;  %v725_v20 = vmul.f32 0.5, %v724_v17  ;;  %910 = vmatpush1.msra.mxu1 %v880_v16  ;;  %v879_v17 = vld [vmem:[%s1909_s4 + $0xa8] sm:$0xff] }
 0x3f1   :  { %911 = vmatprep.subr.mxu1 %v879_v17 }
 0x3f2   :  { %1281 = verf.f32 %v726_v18  ;;  %912 = vmatpush1.msra.mxu1 %v878_v39  ;;  %v877_v18 = vld [vmem:[%s1909_s4 + $0x98] sm:$0xff] }
 0x3f3   :  { %913 = vmatprep.subr.mxu1 %v877_v18 }
 0x3ff   :  { %v1282_v19 = vpop.eup %1281 }
 0x400   :  { %v728_v21 = vadd.f32 1.0, %v1282_v19  ;;  %v876_v19 = vld [vmem:[%s1909_s4 + $0x90] sm:$0xff] }
 0x401   :  { %914 = vmatpush1.msra.mxu1 %v876_v19 }
 0x402   :  { %v729_v22 = vmul.f32 %v728_v21, %v725_v20  ;;  %v875_v20 = vld [vmem:[%s1909_s4 + $0x88] sm:$0xff]  ;;  %v874_v21 = vld [vmem:[%s1909_s4 + $0x80] sm:$0xff] }
 0x403   :  { %915 = vmatprep.subr.mxu1 %v875_v20 }
 0x404   :  { %v731_v23 = vsel %vm730_vm10, %v729_v22, 0.0  ;;  %916 = vmatpush1.msra.mxu1 %v874_v21 }
 0x405   :  { %732 = vadd.xlane.f32.xlu0 %v731_v23  ;;  %v872_v23 = vld [vmem:[%s1909_s4 + $0x70] sm:$0xff] }
 0x48e   :  { %v733_v28 = vpop.xlane.xlu0 %732 }
 0x48f   :  { %v734_v29 = vmul.f32 0.015625, %v733_v28  ;;  %v867_v28 = vld [vmem:[%s1909_s4 + $0x48] sm:$0xff] }
 0x491   :  { %v735_v30 = vsub.f32 %v729_v22, %v734_v29  ;;  %v873_v22 = vld [vmem:[%s1909_s4 + $0x78] sm:$0xff]  ;;  %v866_v29 = vld [vmem:[%s1909_s4 + $0x40] sm:$0xff] }
 0x492   :  { %917 = vmatprep.subr.mxu1 %v873_v22 }
 0x493   :  { %v736_v31 = vsel %vm730_vm10, %v735_v30, 0.0  ;;  %918 = vmatpush1.msra.mxu1 %v872_v23 }
 0x494   :  { %v737_v32 = vmul.f32 %v736_v31, %v736_v31  ;;  %919 = vmatprep.subr.mxu1 %v871_v24  ;;  %v864_v31 = vld [vmem:[%s1909_s4 + $0x30] sm:$0xff] }
 0x495   :  { %920 = vmatpush1.msra.mxu1 %v870_v25 }
 0x496   :  { %738 = vadd.xlane.f32.xlu1 %v737_v32  ;;  %921 = vmatprep.subr.mxu1 %v869_v26  ;;  %v863_v32 = vld [vmem:[%s1909_s4 + $0x28] sm:$0xff] }
 0x497   :  { %922 = vmatpush1.msra.mxu1 %v868_v27 }
 0x498   :  { %923 = vmatprep.subr.mxu1 %v867_v28 }
 0x499   :  { %924 = vmatpush1.msra.mxu1 %v866_v29 }
 0x51f   :  { %v739_v53 = vpop.xlane.xlu1 %738 }
 0x520   :  { %v740_v54 = vmul.f32 0.015625, %v739_v53 }
 0x522   :  { %v741_v55 = vadd.f32 1e-05, %v740_v54 }
 0x524   :  { %1283 = vrsqrt.f32 %v741_v55  ;;  %v892_v55 = vshrl.u32 %v52_v38, 7 }
 0x531   :  { %v1284_v56 = vpop.eup %1283 }
 0x532   :  { %v743_v58 = vmul.f32 %v1284_v56, %v735_v30  ;;  %v865_v30 = vld [vmem:[%s1909_s4 + $0x38] sm:$0xff]  ;;  %v893_v56 = vsub.s32 0, %v892_v55 }
 0x533   :  { %925 = vmatprep.subr.mxu1 %v865_v30 }
 0x534   :  { %v744_v60 = vmul.f32 %v743_v58, %v722_v57  ;;  %926 = vmatpush1.msra.mxu1 %v864_v31  ;;  %v1013_v57 = vld [vmem:[%s1910_s5 + $0x6] ss:$8 sm:$0x3]  ;;  %v897_v58 = vsub.s32 1, %v892_v55 }
 0x535   :  { %927 = vmatprep.subr.mxu1 %v863_v32 }
 0x536   :  { %v745_v61 = vadd.f32 %v744_v60, %v723_v59  ;;  %928 = vmatpush1.msra.mxu1 %v862_v33  ;;  %v894_v59 = vrot.slane %v1013_v57, %v893_v56  ;;  %v898_v60 = vrot.slane %v1013_v57, %v897_v58 }
 0x537   :  { %929 = vmatprep.subr.mxu1 %v861_v34 }
 0x538   :  { %1268 = vmatmul.mubr.f32.vlgmr.msra.gmra.mxu0 %v745_v61  ;;  %930 = vmatpush1.msra.mxu1 %v860_v40 }
 0x539   :  { %931 = vmatprep.subr.mxu1 %v859_v42 }
 0x53a   :  { %932 = vmatpush1.msra.mxu1 %v858_v45 }
 0x5f8   :  { %v831_v62 = vpop.f32.mrf.mxu0 }
 0x5f9   :  { %v832_v63 = vadd.f32 %v831_v62, %v762_v37 }
 0x5fa   :  { %v1269_v0 = vpop.f32.mrf.mxu0 }
 0x5fb   :  { %v836_v1 = vmul.f32 0.70710677, %v832_v63  ;;  %v835_v35 = vmul.f32 0.5, %v832_v63 }
 0x5fd   :  { %1285 = verf.f32 %v836_v1 }
 0x60a   :  { %v1286_v6 = vpop.eup %1285 }
 0x60b   :  { %v838_v36 = vadd.f32 1.0, %v1286_v6 }
 0x60d   :  { %v839_v41 = vmul.f32 %v838_v36, %v835_v35 }
 0x60f   :  { %v841_v43 = vsel %vm840_vm11, %v839_v41, 0.0 }
 0x610   :  { %842 = vadd.xlane.f32.xlu0 %v841_v43 }
 0x699   :  { %v843_v10 = vpop.xlane.xlu0 %842 }
 0x69a   :  { %v844_v11 = vmul.f32 0.03125, %v843_v10 }
 0x69c   :  { %v845_v12 = vsub.f32 %v839_v41, %v844_v11 }
 0x69e   :  { %v846_v13 = vsel %vm840_vm11, %v845_v12, 0.0 }
 0x69f   :  { %v847_v14 = vmul.f32 %v846_v13, %v846_v13 }
 0x6a1   :  { %848 = vadd.xlane.f32.xlu0 %v847_v14 }
 0x72a   :  { %v849_v46 = vpop.xlane.xlu0 %848 }
 0x72b   :  { %v850_v47 = vmul.f32 0.03125, %v849_v46 }
 0x72d   :  { %v851_v48 = vadd.f32 1e-05, %v850_v47 }
 0x72f   :  { %1287 = vrsqrt.f32 %v851_v48 }
 0x73c   :  { %v1288_v49 = vpop.eup %1287 }
 0x73d   :  { %v853_v51 = vmul.f32 %v1288_v49, %v845_v12 }
 0x73f   :  { %v854_v53 = vmul.f32 %v853_v51, %v763_v50 }
 0x741   :  { %v855_v54 = vadd.f32 %v854_v53, %v764_v52 }
 0x743   :  { %966 = vmatmul.mubr.f32.vlgmr.msra.gmra.mxu1 %v855_v54 }
 0x803   :  { %v967_v61 = vpop.f32.mrf.mxu1 }
 0x804   :  { %v968_v37 = vadd.f32 %v967_v61, %v894_v59 }
 0x805   :  { %v969_v62 = vpop.f32.mrf.mxu1 }
 0x806   :  { %972 = vst [vmem:[#allocation7] sm:$0xff] %v968_v37  ;;  %v970_v63 = vadd.f32 %v969_v62, %v898_v60 }
 0x808   :  { %973 = vst [vmem:[#allocation7 + $0x8] sm:$0xff] %v970_v63 }
 0x809   :  { %1340 = shalt.err (!%p1337_p0)
}
 0x80a   :  { %983 = dma.vmem_to_hbm [thread:$0]  %s981_s21, 256, %s1911_s6, [#allocation4]  }
 0x80b   :  { %1353 = dma.done.wait [#allocation4], 256  }
 0x80c   :  { %1354 = vsyncadd [#allocation4], 4294967040 }
 0x80d   :  { %987 = vsyncpa [#allocation3], 1 }
 0x80e   :  { %988 = vsyncpa [#allocation6], 1 }
 0x80f   :  { %989 = vsyncpa [#allocation4], 1 }

</bundles_post_ra>
